<compile_context>
chip_gen: v7x
topology: tpu7x:2x2x1
jax: 0.10.0
libtpu: 0.0.40
codegen_flags: <defaults>
</compile_context>

<pallas_src>
import jax
import jax.numpy as jnp
from jax.experimental import pallas as pl
from jax.experimental.pallas import tpu as pltpu


def output_layer_kernel(x_ref, w_ref, b_ref, o_ref):
    # x_ref: (Cin, t_hw)   -- one batch element, one spatial tile
    # w_ref: (Cout, Cin)   -- resident across the whole grid (constant index_map)
    # b_ref: (Cout, 1)     -- resident across the whole grid
    # o_ref: (Cout, t_hw)  -- lane-dense output tile
    x = x_ref[...].astype(jnp.float32)
    y = jnp.dot(w_ref[...].astype(jnp.float32), x,
                preferred_element_type=jnp.float32)
    y = y + b_ref[...]                  # broadcast (Cout, 1) over the lane axis
    o_ref[...] = jnp.tanh(y).astype(o_ref.dtype)


def _pick_spatial_tile(hw):
    # Largest lane-aligned tile that divides hw (big tiles amortize the
    # ~0.35us per-grid-step overhead; all of these fit trivially in VMEM).
    for t in (2048, 1024, 512, 256, 128):
        if hw % t == 0:
            return t
    return None


def output_layer_forward(x_nchw, weight, bias):
    """1x1 Conv2d + Tanh (PyTorch OutputLayer.forward).

    x_nchw : (N, Cin, H, W) float32
    weight : (Cout, Cin, 1, 1) float32   (PyTorch Conv2d weight layout)
    bias   : (Cout,) float32
    returns: (N, Cout, H, W) float32
    """
    N, Cin, H, W = x_nchw.shape
    Cout = weight.shape[0]
    HW = H * W

    x_flat = x_nchw.reshape(N, Cin, HW)      # free view of NCHW, no transpose
    t_hw = _pick_spatial_tile(HW)
    if t_hw is None:
        # Rare fallback: pad only the spatial axis up to a lane multiple
        # (still no transposes); padded columns are sliced off below.
        HW_pad = ((HW + 127) // 128) * 128
        x_flat = jnp.pad(x_flat, ((0, 0), (0, 0), (0, HW_pad - HW)))
        t_hw = _pick_spatial_tile(HW_pad)
    else:
        HW_pad = HW

    w_mat = weight.reshape(Cout, Cin)        # (Cout, Cin)
    b_col = bias.reshape(Cout, 1)            # (Cout, 1)

    grid = (N, HW_pad // t_hw)

    out_flat = pl.pallas_call(
        output_layer_kernel,
        out_shape=jax.ShapeDtypeStruct((N, Cout, HW_pad), x_nchw.dtype),
        grid_spec=pltpu.PrefetchScalarGridSpec(
            num_scalar_prefetch=0,
            grid=grid,
            in_specs=[
                # batch dim squeezed; last two dims: (Cin == full dim, t_hw % 128 == 0)
                pl.BlockSpec((None, Cin, t_hw), lambda n, j: (n, 0, j)),
                pl.BlockSpec((Cout, Cin), lambda n, j: (0, 0)),
                pl.BlockSpec((Cout, 1), lambda n, j: (0, 0)),
            ],
            out_specs=pl.BlockSpec((None, Cout, t_hw), lambda n, j: (n, 0, j)),
        ),
        compiler_params=pltpu.CompilerParams(
            dimension_semantics=("parallel", "parallel")),
    )(x_flat, w_mat, b_col)

    if HW_pad != HW:
        out_flat = out_flat[:, :, :HW]
    return out_flat.reshape(N, Cout, H, W)


if __name__ == "__main__":
    key = jax.random.PRNGKey(0)
    k_x, k_w, k_b = jax.random.split(key, 3)

    # Small shapes consistent with the module's forward
    N, Cin, Cout, H, W = 2, 4, 3, 16, 16

    x = jax.random.normal(k_x, (N, Cin, H, W), dtype=jnp.float32)
    # Deterministic synthetic parameters (Conv2d(in=4, out=3, k=1) shapes)
    weight = jax.random.normal(k_w, (Cout, Cin, 1, 1), dtype=jnp.float32) * 0.1
    bias = jax.random.normal(k_b, (Cout,), dtype=jnp.float32) * 0.1

    out = output_layer_forward(x, weight, bias)
    out = jax.block_until_ready(out)

    # Reference check against plain JAX (same math as PyTorch 1x1 conv + tanh)
    ref = jnp.tanh(
        jnp.einsum("nchw,oc->nohw", x, weight.reshape(Cout, Cin))
        + bias.reshape(1, Cout, 1, 1)
    )
    assert out.shape == (N, Cout, H, W)
    assert jnp.allclose(out, ref, atol=1e-5), "mismatch vs reference"

    print("KERNEL_OK")
</pallas_src>

<mosaic_0001>
module attributes {stable_mosaic.version = 11 : i64} {
  func.func @output_layer_kernel(%arg0: i32, %arg1: i32, %arg2: memref<1x4x256xf32, #tpu.memory_space<vmem>>, %arg3: memref<3x4xf32, #tpu.memory_space<vmem>>, %arg4: memref<3x1xf32, #tpu.memory_space<vmem>>, %arg5: memref<1x3x256xf32, #tpu.memory_space<vmem>>) attributes {dimension_semantics = [#tpu.dimension_semantics<parallel>, #tpu.dimension_semantics<parallel>], iteration_bounds = array<i64: 2, 1>, scalar_prefetch = 0 : i64, scratch_operands = 0 : i64, tpu.core_type = #tpu.core_type<tc>, window_params = [{transform_indices = @transform_0, window_bounds = array<i64: 1, 4, 256>}, {pipeline_mode = #tpu.pipeline_mode<synchronous>, transform_indices = @transform_1, window_bounds = array<i64: 3, 4>}, {pipeline_mode = #tpu.pipeline_mode<synchronous>, transform_indices = @transform_2, window_bounds = array<i64: 3, 1>}, {transform_indices = @transform_3, window_bounds = array<i64: 1, 3, 256>}]} {
    %c0 = arith.constant 0 : index
    %c0_0 = arith.constant 0 : index
    %c0_1 = arith.constant 0 : index
    %0 = vector.load %arg2[%c0, %c0_0, %c0_1] : memref<1x4x256xf32, #tpu.memory_space<vmem>>, vector<1x4x256xf32>
    %1 = vector.shape_cast %0 : vector<1x4x256xf32> to vector<4x256xf32>
    %c0_2 = arith.constant 0 : index
    %c0_3 = arith.constant 0 : index
    %2 = vector.load %arg3[%c0_2, %c0_3] : memref<3x4xf32, #tpu.memory_space<vmem>>, vector<3x4xf32>
    %cst = arith.constant dense<0.000000e+00> : vector<3x256xf32>
    %3 = tpu.matmul %2, %1, %cst {dimension_numbers = #tpu.dot_dimension_numbers<[1], [0], [0], [1], [0, 0, 1, 1], [], []>} : vector<3x4xf32>, vector<4x256xf32>, vector<3x256xf32> -> vector<3x256xf32>
    %c0_4 = arith.constant 0 : index
    %c0_5 = arith.constant 0 : index
    %4 = vector.load %arg4[%c0_4, %c0_5] : memref<3x1xf32, #tpu.memory_space<vmem>>, vector<3x1xf32>
    %5 = vector.broadcast %4 : vector<3x1xf32> to vector<3x256xf32>
    %6 = arith.addf %3, %5 : vector<3x256xf32>
    %7 = math.tanh %6 : vector<3x256xf32>
    %c0_6 = arith.constant 0 : index
    %c0_7 = arith.constant 0 : index
    %c0_8 = arith.constant 0 : index
    %8 = vector.load %arg5[%c0_6, %c0_7, %c0_8] : memref<1x3x256xf32, #tpu.memory_space<vmem>>, vector<1x3x256xf32>
    %9 = vector.shape_cast %8 : vector<1x3x256xf32> to vector<3x256xf32>
    %10 = vector.shape_cast %7 : vector<3x256xf32> to vector<1x3x256xf32>
    tpu.vector_store %arg5[%c0_6, %c0_7, %c0_8], %10 {strides = array<i32>} : memref<1x3x256xf32, #tpu.memory_space<vmem>>, vector<1x3x256xf32>,
    return
  }
  func.func @transform_0(%arg0: i32, %arg1: i32) -> (i32, i32, i32) {
    %c0_i32 = arith.constant 0 : i32
    %c0_i32_0 = arith.constant 0 : i32
    return %arg0, %c0_i32, %arg1 : i32, i32, i32
  }
  func.func @transform_1(%arg0: i32, %arg1: i32) -> (i32, i32) {
    %c0_i32 = arith.constant 0 : i32
    %c0_i32_0 = arith.constant 0 : i32
    %c0_i32_1 = arith.constant 0 : i32
    return %c0_i32, %c0_i32_0 : i32, i32
  }
  func.func @transform_2(%arg0: i32, %arg1: i32) -> (i32, i32) {
    %c0_i32 = arith.constant 0 : i32
    %c0_i32_0 = arith.constant 0 : i32
    %c0_i32_1 = arith.constant 0 : i32
    return %c0_i32, %c0_i32_0 : i32, i32
  }
  func.func @transform_3(%arg0: i32, %arg1: i32) -> (i32, i32, i32) {
    %c0_i32 = arith.constant 0 : i32
    %c0_i32_0 = arith.constant 0 : i32
    return %arg0, %c0_i32, %arg1 : i32, i32, i32
  }
}

</mosaic_0001>

<bundles_post_ra>
// kernel: tpu_custom_call.1
= control target key start
LH: loop header
LB: loop body
LE: loop exit
PB: predicated region body
PF: predicated region fallthrough
CT: control target
= control target key end

     0   :  { %8 = vsyncpa [#allocation3], 0  ;;  %s726_s0 = inlined_call_operand.hbm [shape: f32[2,4,256], index: 0, kind: input, shape index: {}]   ;;  %s727_s1 = inlined_call_operand.vmem [shape: f32[3,4], index: 1, kind: input, shape index: {}]   ;;  %s728_s2 = inlined_call_operand.vmem [shape: f32[3,1], index: 2, kind: input, shape index: {}]   ;;  %s729_s3 = inlined_call_operand.vmem [shape: f32[2,3,256], index: 3, kind: output, shape index: {}]  }
   0x1   :  { %10 = vsyncpa [#allocation3 + $0x1], 0  ;;  %s595_s12 = smov 0   ;;  %s597_s13 = smov 0  }
   0x2   :  { %s599_s14 = smov 0   ;;  %s601_s15 = smov 0  }
   0x3   :  { %s603_s16 = smov 0   ;;  %s605_s17 = smov 0  }
   0x4 LB: > { %s409_s18 = sadd.s32 4294967295, %s570_s17   ;;  %s28_s19 = sadd.s32 1, %s566_s16  ;;  %s570_s17 = sphi %s605_s17, %s16_s17   ;;  %s566_s16 = sphi %s603_s16, %s739_s16   ;;  %s562_s15 = sphi %s601_s15, %s738_s15   ;;  %s558_s14 = sphi %s599_s14, %s737_s14   ;;  %s554_s13 = sphi %s597_s13, %s736_s13   ;;  %s550_s12 = sphi %s595_s12, %s735_s12  }
   0x5   : > { %p30_p0 = scmp.ge.s32.totalorder %s28_s19, 2  ;;  %s37_s20 = sadd.s32 1, %s558_s14 }
   0x6   : > { %p44_p1 = scmp.ne.s32.totalorder %s558_s14, %s554_s13  ;;  %p45_p2 = scmp.eq.s32.totalorder %s570_s17, 0 }
   0x7   : > { %s741_s19 = smov (%p30_p0, %s28_s19), 0  ;;  %p50_p4 = scmp.ne.s32.totalorder %s554_s13, %s550_s12 }
   0x8   : > { %p631_p3 = por %p45_p2, %p44_p1  ;;  %s32_s22 = ssub.s32 %s566_s16, %s741_s19 }
   0x9   : > { %p51_p5 = scmp.eq.s32.totalorder %s409_s18, 0  ;;  %p35_p6 = scmp.eq.s32.totalorder %s32_s22, 0 }
   0xa   : > { %p433_p8 = scmp.lt.s32.totalorder %s570_s17, 2  ;;  %s150_s25 = sand.u32 1, %s558_s14  }
   0xb   : > { %p638_p7 = por %p51_p5, %p50_p4  ;;  %s425_s26 = sshll.u32 %s566_s16, 7 }
   0xc   : > { %s644_s24 = scalar_select %p35_p6, %s558_s14, %s37_s20  }
   0xd   : > { %s413_s27 = sshll.u32 %s150_s25, 3  ;;  %s651_s30 = scalar_lea.hbm %s726_s0, %s425_s26 }
   0xe   : > { %s154_s4 = scalar_lea.vmem [#allocation2], %s413_s27  ;;  %p655_p9 = pnand %p433_p8, %p631_p3 }
   0xf   : > { %s164_s5 = sshll.u32 %s154_s4, 4  ;;  %s151_s7 = scalar_lea.sflag [#allocation3], %s150_s25  ;;  %s659_s5 = int_to_ptr.vmem [resolvable:$true] %s164_s5 }
  0x10   : > { %s490_s8 = scalar_lea.hbm %s651_s30, 128  ;;  %p492_p13 = pneg %p655_p9 }
  0x11   : > { %p491_p12 = scmp.ne.s32.totalorder %s651_s30, %s490_s8  ;;  %s495_s11 = scalar_lea.hbm %s726_s0, 256 }
  0x12   : > { %p496_p2 = scmp.lt.u32.totalorder %s651_s30, %s726_s0  ;;  %p497_p3 = scmp.lt.u32.totalorder %s495_s11, %s490_s8 }
  0x13   : > { %p493_p0 = pnand %p492_p13, %p491_p12  ;;  %p499_p5 = scmp.lt.u32.totalorder %s490_s8, %s651_s30 }
  0x14   : > { %p498_p4 = por %p497_p3, %p496_p2 }
  0x15   : > { %p494_p1 = pneg %p493_p0 }
  0x16   : > { %p500_p6 = por %p499_p5, %p498_p4 }
  0x18   : > { %p501_p8 = pnand %p500_p6, %p494_p1 }
  0x1a   : > { %504 = shalt.err (!%p501_p8)
}
  0x1b   : > { %s505_s20 = scalar_lea.vmem %s659_s5, 128  ;;  %s572_s21 = smov [#allocation2]  }
  0x1c   : > { %p506_p12 = scmp.ne.s32.totalorder %s659_s5, %s505_s20  ;;  %s510_s22 = sshll.u32 %s572_s21, 4  ;;  %s511_s22 = int_to_ptr.vmem [resolvable:$false] %s510_s22 }
  0x1d   : > { %s512_s25 = scalar_lea.vmem %s511_s22, 256  ;;  %p513_p11 = scmp.lt.s32.totalorder %s659_s5, %s511_s22 }
  0x1e   : > { %p508_p0 = pnand %p506_p12, %p492_p13  ;;  %p514_p2 = scmp.lt.s32.totalorder %s512_s25, %s505_s20 }
  0x20   : > { %p509_p10 = pneg %p508_p0  ;;  %p515_p3 = por %p514_p2, %p513_p11 }
  0x22   : > { %p516_p4 = pnand %p515_p3, %p509_p10 }
  0x24   : > { %519 = shalt.err (!%p516_p4)
}
  0x25   : > { %432 = dma.hbm_to_vmem [thread:$0]  (!%p655_p9), %s651_s30, 128, %s659_s5, %s151_s7  }
  0x26   : > { %p733_p1 = scmp.lt.s32.totalorder %s570_s17, 3  ;;  %p734_p5 = scmp.ge.s32.totalorder %s570_s17, 1 }
  0x28   : > { %p170_p13 = pnand %p734_p5, %p733_p1 }
  0x29   : > { %s175_s26 = sand.u32 (!%p170_p13), 1, %s554_s13  }
  0x2a   : > { %173 = sbr.rel (%p170_p13) target bundleno = 284 (0x11c), region = 32  ;;  %s417_s27 = sshll.u32 (!%p170_p13), %s175_s26, 3 }
  0x2b   : > { %s176_s28 = scalar_lea.sflag (!%p170_p13), [#allocation3], %s175_s26  ;;  %s179_s29 = scalar_lea.vmem (!%p170_p13), [#allocation2], %s417_s27 }
  0x31   : > { %545 = dma.done.wait (%p638_p7), %s176_s28, 128  }
  0x32   : > { %547 = vsyncadd (%p638_p7), %s176_s28, 4294967168  ;;  %v573_v0 = vmov 0.0   ;;  %v574_v1 = vmov 0   ;;  %v217_v2 = vld [vmem:[%s179_s29] sm:$0xff]  ;;  %vm231_vm0 = vcmask 1043456   ;;  %vm227_vm1 = vcmask 31744  }
  0x33   : > { %300 = vmatprep.mubr.f32.mxu0 %v573_v0  ;;  %484 = vset.pattern.permute.xlu0 %v574_v1  ;;  %v219_v3 = vld [vmem:[%s728_s2] sm:$0x7]  ;;  %v226_v4 = vcombine.high %v217_v2, %v217_v2  ;;  %p208_p7 = scmp.lt.s32.totalorder %s562_s15, 1 }
  0x34   : > { %222 = vperm.xlu0 %484, %v219_v3   ;;  %v218_v5 = vld [vmem:[%s727_s1] sm:$0x7] }
  0x35   : > { %420 = vmatprep.subr.msk.mxu0 %vm231_vm0, %v226_v4  ;;  %s743_s15 = smov (!%p208_p7, %s562_s15), 1 }
  0x36   : > { %421 = vmatpush1.msk.msra.mxu0 %vm231_vm0, %v217_v2  ;;  %s426_s23 = sshll.u32 %s743_s15, 3 }
  0x37   : > { %422 = vmatmul.mubr.msk.f32.vlgmr.msra.gmra.mrb[0].mxu0 %vm227_vm1, %v218_v5  ;;  %s215_s9 = scalar_lea.vmem %s729_s3, %s426_s23 }
  0xb3   : > { %v223_v6 = vpop.permute.xlu0 %222 }
 0x10a   : > { %v302_v7 = vpop.f32.mrb[0].mxu0 }
 0x10b   : > { %v303_v8 = vadd.f32 %v302_v7, %v223_v6  ;;  %v304_v9 = vpop.f32.mrb[1].mxu0 }
 0x10c   : > { %v305_v10 = vadd.f32 %v304_v9, %v223_v6 }
 0x10d   : > { %486 = vtanh.f32 %v303_v8 }
 0x10e   : > { %488 = vtanh.f32 %v305_v10 }
 0x117   : > { %v487_v11 = vpop.eup %486 }
 0x118   : > { %v489_v12 = vpop.eup %488 }
 0x119   : > { %v311_v13 = vcombine.low %v487_v11, %v489_v12 }
 0x11b   : > { %313 = vst [vmem:[%s215_s9] sm:$0x77] %v311_v13 }
 0x11c PF: > { %s16_s17 = sadd.s32 1, %s570_s17   ;;  %s735_s12 = smov %s554_s13 }
 0x11d   : > { %p13_p9 = scmp.ge.s32.totalorder %s16_s17, 4   ;;  %s736_s13 = smov %s558_s14 }
 0x11e   : > { %s737_s14 = smov %s644_s24  ;;  %s738_s15 = smov %s566_s16 }
 0x11f   : > { %s739_s16 = smov %s741_s19  ;;  %15 = sbr.rel (!%p13_p9) target bundleno = 4 (0x4), region = 72 }
 0x126   :  { %344 = vsyncpa [#allocation3], 1 }
 0x127   :  { %346 = vsyncpa [#allocation3 + $0x1], 1 }

</bundles_post_ra>
